<compile_context>
chip_gen: v6e
topology: v6e:2x2x1
jax: 0.10.0
libtpu: 0.0.40
codegen_flags: <defaults>
</compile_context>

<pallas_src>
import jax
import jax.numpy as jnp
from jax.experimental import pallas as pl
from jax.experimental.pallas import tpu as pltpu


def text_encoder_kernel(x_ref, w1_ref, b1_ref, w2_ref, b2_ref, o_ref):
    # x_ref:  (TB, D_in)    w1_ref: (D_in, H)    b1_ref: (1, H)
    # w2_ref: (H, D_out)    b2_ref: (1, D_out)   o_ref:  (TB, D_out)
    #
    # Cast activations to the weight dtype (bf16) so the MXU issues at native
    # rate; accumulate in f32 and add the f32 biases after accumulation.
    x = x_ref[...].astype(w1_ref.dtype)
    h = jnp.dot(x, w1_ref[...], preferred_element_type=jnp.float32) + b1_ref[...]
    h = jnp.maximum(h, 0.0)                       # ReLU
    # Dropout(p=0.1) -> identity in eval mode.
    y = jnp.dot(h.astype(w2_ref.dtype), w2_ref[...],
                preferred_element_type=jnp.float32) + b2_ref[...]
    o_ref[...] = y.astype(o_ref.dtype)


def _round_up(n, m):
    return ((n + m - 1) // m) * m


def _cdiv(a, b):
    return -(-a // b)


def _cost_estimate(B, D_in, H, D_out, x, w1, b1, w2, b2, out_dtype):
    flops = 2 * B * (D_in * H + H * D_out)
    bytes_accessed = (
        x.size * x.dtype.itemsize
        + w1.size * w1.dtype.itemsize + b1.size * b1.dtype.itemsize
        + w2.size * w2.dtype.itemsize + b2.size * b2.dtype.itemsize
        + B * D_out * jnp.dtype(out_dtype).itemsize)
    return pl.CostEstimate(flops=flops, transcendentals=0,
                           bytes_accessed=bytes_accessed)


def _vmem_bytes_needed(tile_b, D_in, H, D_out, x_dtype, w_dtype, out_dtype):
    isz = lambda dt: jnp.dtype(dt).itemsize
    x_tile = 2 * tile_b * D_in * isz(x_dtype)        # double-buffered input tile
    o_tile = 2 * tile_b * D_out * isz(out_dtype)     # double-buffered output tile
    h_tmp = tile_b * max(H, D_out) * 4               # f32 intermediate
    w_res = (D_in * H + H * D_out) * isz(w_dtype) + (H + D_out) * 4  # resident
    return x_tile + o_tile + h_tmp + w_res


def text_encoder_forward(x, w1, b1, w2, b2, *, tile_b=2048,
                         gridless_max_batch=256, out_dtype=None):
    """TextEncoder forward: Linear -> ReLU -> (Dropout=identity) -> Linear.

    Pass out_dtype=jnp.bfloat16 (and feed bf16 `x`) when the fusion-embedding
    consumer accepts bf16 -- the kernel is HBM-bound at large batch and this
    halves the dominant activation traffic.
    """
    B, D_in = x.shape
    H = w1.shape[1]
    D_out = w2.shape[1]
    out_dtype = out_dtype if out_dtype is not None else x.dtype
    cost = _cost_estimate(B, D_in, H, D_out, x, w1, b1, w2, b2, out_dtype)

    if B <= max(gridless_max_batch, 8):
        # Small-batch fast path: the whole problem (< ~1 MB) runs as a single
        # gridless call -- no pipeline prologue/epilogue, one DMA in/out,
        # weights fetched exactly once. Operands pinned to VMEM explicitly.
        return pl.pallas_call(
            text_encoder_kernel,
            out_shape=jax.ShapeDtypeStruct((B, D_out), out_dtype),
            in_specs=[pl.BlockSpec(memory_space=pltpu.MemorySpace.VMEM)] * 5,
            out_specs=pl.BlockSpec(memory_space=pltpu.MemorySpace.VMEM),
            cost_estimate=cost,
        )(x, w1, b1, w2, b2)

    # ---- Large-batch path: tile only the batch (M) axis. ----
    # Big tiles amortize the ~0.35 us per-step pipeline overhead; clamp to the
    # (rounded-up) batch and keep the sublane multiple-of-8 constraint.
    tile_b = max(8, min(_round_up(tile_b, 8), _round_up(B, 8)))
    num_steps = _cdiv(B, tile_b)
    # v7x megacore: prefer an even step count so ("parallel",) shards the grid
    # evenly across the two TensorCores (odd counts idle one TC for a step).
    if num_steps > 1 and num_steps % 2 == 1:
        alt_tile = max(8, _round_up(_cdiv(B, num_steps + 1), 8))
        if _cdiv(B, alt_tile) % 2 == 0:
            tile_b = alt_tile
            num_steps = _cdiv(B, alt_tile)

    # Raise the scoped-VMEM limit only when the tile footprint actually needs
    # it (v5e default is 16 MiB); cap at 48 MiB to stay within v7x's 64 MiB.
    needed = _vmem_bytes_needed(tile_b, D_in, H, D_out,
                                x.dtype, w1.dtype, out_dtype)
    vmem_limit = None
    if 2 * needed > (16 << 20):
        vmem_limit = int(min(2 * needed, 48 << 20))

    grid_spec = pltpu.PrefetchScalarGridSpec(
        num_scalar_prefetch=0,
        grid=(num_steps,),
        in_specs=[
            # x tile (double-buffered by default; ragged last tile is masked).
            pl.BlockSpec((tile_b, D_in), lambda i: (i, 0)),
            # Weights / biases: constant index map -> VMEM-resident, and
            # single-buffered (double-buffering would only waste VMEM).
            pl.BlockSpec((D_in, H), lambda i: (0, 0),
                         pipeline_mode=pl.Buffered(1)),
            pl.BlockSpec((1, H), lambda i: (0, 0),
                         pipeline_mode=pl.Buffered(1)),
            pl.BlockSpec((H, D_out), lambda i: (0, 0),
                         pipeline_mode=pl.Buffered(1)),
            pl.BlockSpec((1, D_out), lambda i: (0, 0),
                         pipeline_mode=pl.Buffered(1)),
        ],
        out_specs=pl.BlockSpec((tile_b, D_out), lambda i: (i, 0)),
    )
    return pl.pallas_call(
        text_encoder_kernel,
        out_shape=jax.ShapeDtypeStruct((B, D_out), out_dtype),
        grid_spec=grid_spec,
        compiler_params=pltpu.CompilerParams(
            dimension_semantics=("parallel",),
            vmem_limit_bytes=vmem_limit,
        ),
        cost_estimate=cost,
    )(x, w1, b1, w2, b2)


def init_params(key, text_embed_dim, hidden_dim, fusion_embed_dim,
                weight_dtype=jnp.bfloat16):
    """nn.Linear-style uniform(-1/sqrt(fan_in), 1/sqrt(fan_in)) init.

    Weights are cast to `weight_dtype` (bf16) for native-rate MXU issue and
    halved HBM traffic; biases stay f32 (added after f32 accumulation).
    """
    k1, k2, k3, k4 = jax.random.split(key, 4)
    lim1 = 1.0 / (text_embed_dim ** 0.5)
    lim2 = 1.0 / (hidden_dim ** 0.5)
    w1 = jax.random.uniform(k1, (text_embed_dim, hidden_dim), jnp.float32,
                            -lim1, lim1).astype(weight_dtype)
    b1 = jax.random.uniform(k2, (1, hidden_dim), jnp.float32, -lim1, lim1)
    w2 = jax.random.uniform(k3, (hidden_dim, fusion_embed_dim), jnp.float32,
                            -lim2, lim2).astype(weight_dtype)
    b2 = jax.random.uniform(k4, (1, fusion_embed_dim), jnp.float32, -lim2, lim2)
    return w1, b1, w2, b2


if __name__ == "__main__":
    # NexTGPTConfig dims (already TPU-friendly multiples of 128).
    text_embed_dim = 384
    hidden_dim = 128
    fusion_embed_dim = 256
    batch = 16

    key = jax.random.PRNGKey(0)
    k_x, k_p, k_x2 = jax.random.split(key, 3)

    x = jax.random.normal(k_x, (batch, text_embed_dim), dtype=jnp.float32)
    w1, b1, w2, b2 = init_params(k_p, text_embed_dim, hidden_dim,
                                 fusion_embed_dim)

    def ref_fn(xv):
        # Reference: identical math (bf16 operands, f32 accumulation) in JAX.
        xb = xv.astype(w1.dtype)
        h = jnp.dot(xb, w1, preferred_element_type=jnp.float32) + b1
        h = jnp.maximum(h, 0.0)
        return jnp.dot(h.astype(w2.dtype), w2,
                       preferred_element_type=jnp.float32) + b2

    # 1) Small-batch gridless path (the common inference case).
    out = jax.block_until_ready(text_encoder_forward(x, w1, b1, w2, b2))
    ref = ref_fn(x)
    assert out.shape == (batch, fusion_embed_dim)
    assert out.dtype == jnp.float32
    max_err = float(jnp.max(jnp.abs(out - ref)))
    assert jnp.allclose(out, ref, atol=2e-2, rtol=2e-2), f"max_err={max_err}"

    # 2) Tiled large-batch path exercised at small scale (ragged last tile:
    #    40 rows with a 16-row tile -> cdiv grid of 3 steps, last one partial).
    x2 = jax.random.normal(k_x2, (40, text_embed_dim), dtype=jnp.float32)
    out2 = jax.block_until_ready(
        text_encoder_forward(x2, w1, b1, w2, b2, tile_b=16,
                             gridless_max_batch=0))
    ref2 = ref_fn(x2)
    assert out2.shape == (40, fusion_embed_dim)
    max_err2 = float(jnp.max(jnp.abs(out2 - ref2)))
    assert jnp.allclose(out2, ref2, atol=2e-2, rtol=2e-2), f"max_err={max_err2}"

    print("KERNEL_OK")
</pallas_src>

<mosaic_0001>
module attributes {stable_mosaic.version = 11 : i64} {
  func.func @text_encoder_kernel(%arg0: memref<16x384xf32, #tpu.memory_space<vmem>>, %arg1: memref<384x128xbf16, #tpu.memory_space<vmem>>, %arg2: memref<1x128xf32, #tpu.memory_space<vmem>>, %arg3: memref<128x256xbf16, #tpu.memory_space<vmem>>, %arg4: memref<1x256xf32, #tpu.memory_space<vmem>>, %arg5: memref<16x256xf32, #tpu.memory_space<vmem>>) attributes {dimension_semantics = [], scalar_prefetch = 0 : i64, scratch_operands = 0 : i64, tpu.core_type = #tpu.core_type<tc>} {
    %c0 = arith.constant 0 : index
    %c0_0 = arith.constant 0 : index
    %0 = vector.load %arg0[%c0, %c0_0] : memref<16x384xf32, #tpu.memory_space<vmem>>, vector<16x384xf32>
    %1 = arith.truncf %0 : vector<16x384xf32> to vector<16x384xbf16>
    %c0_1 = arith.constant 0 : index
    %c0_2 = arith.constant 0 : index
    %2 = vector.load %arg1[%c0_1, %c0_2] : memref<384x128xbf16, #tpu.memory_space<vmem>>, vector<384x128xbf16>
    %cst = arith.constant dense<0.000000e+00> : vector<16x128xf32>
    %3 = tpu.matmul %1, %2, %cst {dimension_numbers = #tpu.dot_dimension_numbers<[1], [0], [0], [1], [0, 0, 1, 1], [], []>} : vector<16x384xbf16>, vector<384x128xbf16>, vector<16x128xf32> -> vector<16x128xf32>
    %c0_3 = arith.constant 0 : index
    %c0_4 = arith.constant 0 : index
    %4 = vector.load %arg2[%c0_3, %c0_4] : memref<1x128xf32, #tpu.memory_space<vmem>>, vector<1x128xf32>
    %5 = vector.broadcast %4 : vector<1x128xf32> to vector<16x128xf32>
    %6 = arith.addf %3, %5 : vector<16x128xf32>
    %cst_5 = arith.constant 0.000000e+00 : f32
    %7 = vector.broadcast %cst_5 : f32 to vector<16x128xf32>
    %8 = arith.maximumf %6, %7 : vector<16x128xf32>
    %9 = arith.truncf %8 : vector<16x128xf32> to vector<16x128xbf16>
    %c0_6 = arith.constant 0 : index
    %c0_7 = arith.constant 0 : index
    %10 = vector.load %arg3[%c0_6, %c0_7] : memref<128x256xbf16, #tpu.memory_space<vmem>>, vector<128x256xbf16>
    %cst_8 = arith.constant dense<0.000000e+00> : vector<16x256xf32>
    %11 = tpu.matmul %9, %10, %cst_8 {dimension_numbers = #tpu.dot_dimension_numbers<[1], [0], [0], [1], [0, 0, 1, 1], [], []>} : vector<16x128xbf16>, vector<128x256xbf16>, vector<16x256xf32> -> vector<16x256xf32>
    %c0_9 = arith.constant 0 : index
    %c0_10 = arith.constant 0 : index
    %12 = vector.load %arg4[%c0_9, %c0_10] : memref<1x256xf32, #tpu.memory_space<vmem>>, vector<1x256xf32>
    %13 = vector.broadcast %12 : vector<1x256xf32> to vector<16x256xf32>
    %14 = arith.addf %11, %13 : vector<16x256xf32>
    %c0_11 = arith.constant 0 : index
    %c0_12 = arith.constant 0 : index
    %15 = vector.load %arg5[%c0_11, %c0_12] : memref<16x256xf32, #tpu.memory_space<vmem>>, vector<16x256xf32>
    tpu.vector_store %arg5[%c0_11, %c0_12], %14 {strides = array<i32>} : memref<16x256xf32, #tpu.memory_space<vmem>>, vector<16x256xf32>,
    return
  }
}

</mosaic_0001>

<bundles_post_ra>
// kernel: tpu_custom_call.1
= control target key start
LH: loop header
LB: loop body
LE: loop exit
PB: predicated region body
PF: predicated region fallthrough
CT: control target
= control target key end

     0   :  { %10 = vsyncpa [#allocation3], 0  ;;  %s842_s0 = inlined_call_operand.hbm [shape: f32[16,384], index: 0, kind: input, shape index: {}]   ;;  %s843_s1 = inlined_call_operand.hbm [shape: bf16[384,128], index: 1, kind: input, shape index: {}]   ;;  %s844_s2 = inlined_call_operand.vmem [shape: f32[1,128], index: 2, kind: input, shape index: {}]   ;;  %s845_s3 = inlined_call_operand.hbm [shape: bf16[128,256], index: 3, kind: input, shape index: {}]   ;;  %s846_s4 = inlined_call_operand.vmem [shape: f32[1,256], index: 4, kind: input, shape index: {}]   ;;  %s847_s5 = inlined_call_operand.hbm [shape: f32[16,256], index: 5, kind: output, shape index: {}]  }
   0x1   :  { %11 = vsyncpa [#allocation6], 0 }
   0x2   :  { %12 = vsyncpa [#allocation4], 0  ;;  %s770_s18 = smov [#allocation5]  }
   0x3   :  { %s30_s19 = sshll.u32 %s770_s18, 4  ;;  %s31_s19 = int_to_ptr.vmem [resolvable:$true] %s30_s19 }
   0x4   :  { %s692_s20 = scalar_lea.vmem %s31_s19, 3072  ;;  %p697_p1 = scmp.lt.s32.totalorder %s31_s19, %s31_s19 }
   0x5   :  { %p693_p0 = scmp.ne.s32.totalorder %s31_s19, %s692_s20  ;;  %p698_p2 = scmp.lt.s32.totalorder %s692_s20, %s692_s20 }
   0x7   :  { %p699_p3 = por %p698_p2, %p697_p1 }
   0x9   :  { %p700_p4 = pnand %p699_p3, %p693_p0 }
   0xb   :  { %703 = shalt.err (!%p700_p4)
}
   0xc   :  { %s771_s21 = smov 64   ;;  %s772_s22 = smov 4  }
   0xd   :  { %36 = dma.hbm_to_vmem [thread:$0]  %s843_s1, 3072, %s31_s19, [#allocation6], %s771_s21, %s771_s21, %s772_s22  }
   0xe   :  { %s773_s25 = smov [#allocation2]  }
   0xf   :  { %s18_s26 = sshll.u32 %s773_s25, 4  ;;  %s19_s26 = int_to_ptr.vmem [resolvable:$true] %s18_s26 }
  0x10   :  { %s712_s27 = scalar_lea.vmem %s19_s26, 768  ;;  %p717_p6 = scmp.lt.s32.totalorder %s19_s26, %s19_s26 }
  0x11   :  { %p713_p5 = scmp.ne.s32.totalorder %s19_s26, %s712_s27  ;;  %p718_p7 = scmp.lt.s32.totalorder %s712_s27, %s712_s27 }
  0x13   :  { %p719_p8 = por %p718_p7, %p717_p6 }
  0x15   :  { %p720_p9 = pnand %p719_p8, %p713_p5 }
  0x17   :  { %723 = shalt.err (!%p720_p9)
}
  0x18   :  { %s774_s28 = smov 384   ;;  %s775_s29 = smov 24  }
  0x19   :  { %24 = dma.hbm_to_vmem [thread:$0]  %s842_s0, 768, %s19_s26, [#allocation3], %s774_s28, %s774_s28, %s775_s29  }
  0x1a   :  { %s776_s7 = smov [#allocation7]  }
  0x1b   :  { %s44_s8 = sshll.u32 %s776_s7, 4  ;;  %s45_s8 = int_to_ptr.vmem [resolvable:$true] %s44_s8 }
  0x1c   :  { %s732_s1 = scalar_lea.vmem %s45_s8, 2048  ;;  %p737_p11 = scmp.lt.s32.totalorder %s45_s8, %s45_s8 }
  0x1d   :  { %p733_p10 = scmp.ne.s32.totalorder %s45_s8, %s732_s1  ;;  %p738_p12 = scmp.lt.s32.totalorder %s732_s1, %s732_s1 }
  0x1f   :  { %p739_p13 = por %p738_p12, %p737_p11 }
  0x21   :  { %p740_p0 = pnand %p739_p13, %p733_p10 }
  0x23   :  { %743 = shalt.err (!%p740_p0)
}
  0x24   :  { %s777_s9 = smov 128   ;;  %s778_s10 = smov 8  }
  0x25   :  { %50 = dma.hbm_to_vmem [thread:$0]  %s845_s3, 2048, %s45_s8, [#allocation6], %s777_s9, %s777_s9, %s778_s10  }
  0x26   :  { %764 = dma.done.wait [#allocation3], 768  }
  0x27   :  { %765 = vsyncadd [#allocation3], 4294966528 }
  0x28   :  { %766 = dma.done.wait [#allocation6], 5120  }
  0x29   :  { %767 = vsyncadd [#allocation6], 4294962176  ;;  %v779_v0 = vmov 0.0   ;;  %vm780_vm0 = vmmov 0   ;;  %v636_v1 = vld [vmem:[#allocation5 + $0x78] sm:$0xff]   ;;  %v639_v4 = vld [vmem:[#allocation5 + $0x70] sm:$0xff]  }
  0x2a   :  { %601 = vmatprep.subr.bf16.mxu1 %v779_v0  ;;  %617 = vmatprep.mubr.msk.bf16.mxu1 %vm780_vm0, %v779_v0  ;;  %v637_v2 = vld [vmem:[#allocation5 + $0x38] sm:$0xff]   ;;  %v640_v5 = vld [vmem:[#allocation5 + $0x30] sm:$0xff]   ;;  %v642_v7 = vld [vmem:[#allocation5 + $0x68] sm:$0xff]   ;;  %v781_v50 = vmov 0   ;;  %s782_s14 = smov [#allocation8]  }
  0x2b   :  { %570 = vmatprep.subr.bf16.mxu0 %v636_v1  ;;  %v638_v3 = vld [vmem:[#allocation5 + $0xb8] sm:$0xff]   ;;  %v641_v6 = vld [vmem:[#allocation5 + $0xb0] sm:$0xff]   ;;  %v643_v8 = vld [vmem:[#allocation5 + $0x28] sm:$0xff]   ;;  %s516_s15 = sshll.u32 %s782_s14, 4  ;;  %s517_s15 = int_to_ptr.vmem [resolvable:$true] %s516_s15 }
  0x2c   :  { %571 = vmatpush3.bf16.msra.mxu0 %v637_v2  ;;  %602 = vmatpush3.bf16.msra.mxu1 %v638_v3  ;;  %v644_v9 = vld [vmem:[#allocation5 + $0xa8] sm:$0xff]   ;;  %v645_v10 = vld [vmem:[#allocation5 + $0x60] sm:$0xff]   ;;  %v648_v13 = vld [vmem:[#allocation5 + $0x58] sm:$0xff]   ;;  %s744_s16 = scalar_lea.vmem %s517_s15, 512  ;;  %p749_p2 = scmp.lt.s32.totalorder %s517_s15, %s517_s15 }
  0x2d   :  { %572 = vmatprep.subr.bf16.mxu0 %v639_v4  ;;  %603 = vmatprep.subr.bf16.mxu1 %v779_v0  ;;  %v646_v11 = vld [vmem:[#allocation5 + $0x20] sm:$0xff]   ;;  %v649_v14 = vld [vmem:[#allocation5 + $0x18] sm:$0xff]   ;;  %v651_v16 = vld [vmem:[#allocation5 + $0x50] sm:$0xff]   ;;  %p745_p1 = scmp.ne.s32.totalorder %s517_s15, %s744_s16  ;;  %p750_p3 = scmp.lt.s32.totalorder %s744_s16, %s744_s16 }
  0x2e   :  { %v647_v12 = vld [vmem:[#allocation5 + $0xa0] sm:$0xff]   ;;  %v650_v15 = vld [vmem:[#allocation5 + $0x98] sm:$0xff]   ;;  %v652_v17 = vld [vmem:[#allocation5 + $0x10] sm:$0xff]  }
  0x2f   :  { %v653_v18 = vld [vmem:[#allocation5 + $0x90] sm:$0xff]   ;;  %v654_v19 = vld [vmem:[#allocation5 + $0x48] sm:$0xff]   ;;  %v657_v22 = vld [vmem:[#allocation5 + $0x40] sm:$0xff]   ;;  %p751_p4 = por %p750_p3, %p749_p2 }
  0x30   :  { %573 = vmatpush3.bf16.msra.mxu0 %v640_v5  ;;  %604 = vmatpush3.bf16.msra.mxu1 %v641_v6  ;;  %v655_v20 = vld [vmem:[#allocation5 + $0x8] sm:$0xff]   ;;  %v64_v23 = vld [vmem:[#allocation2 + $0x8] sm:$0xff]  ;;  %v67_v24 = vld [vmem:[#allocation2 + $0x20] sm:$0xff]  ;;  %v374_v5 = vlaneseq }
  0x31   :  { %574 = vmatprep.subr.bf16.mxu0 %v642_v7  ;;  %605 = vmatprep.subr.bf16.mxu1 %v779_v0  ;;  %v656_v21 = vld [vmem:[#allocation5 + $0x88] sm:$0xff]   ;;  %v658_v25 = vld [vmem:[#allocation5] sm:$0xff]   ;;  %v70_v26 = vpack.c.bf16 %v67_v24, %v64_v23  ;;  %v63_v27 = vld [vmem:[#allocation2] sm:$0xff]  ;;  %p752_p5 = pnand %p751_p4, %p745_p1 }
  0x32   :  { %v659_v28 = vld [vmem:[#allocation5 + $0x80] sm:$0xff]   ;;  %v66_v29 = vld [vmem:[#allocation2 + $0x18] sm:$0xff]  ;;  %v68_v31 = vld [vmem:[#allocation2 + $0x28] sm:$0xff]  ;;  %v375_v6 = vshrl.u32 %v374_v5, 7 }
  0x33   :  { %303 = vmatprep.mubr.bf16.mxu0 %v70_v26  ;;  %v65_v30 = vld [vmem:[#allocation2 + $0x10] sm:$0xff]  ;;  %v662_v32 = vld [vmem:[#allocation7 + $0x74] ss:$8 sps:$4 sm:$0xff]   ;;  %v69_v33 = vpack.c.bf16 %v66_v29, %v63_v27  ;;  %v660_v34 = vld [vmem:[#allocation7 + $0x70] ss:$8 sps:$4 sm:$0xff]  }
  0x34   :  { %575 = vmatpush3.bf16.msra.mxu0 %v643_v8  ;;  %606 = vmatpush3.bf16.msra.mxu1 %v644_v9  ;;  %v71_v35 = vpack.c.bf16 %v68_v31, %v65_v30  ;;  %v665_v36 = vld [vmem:[#allocation7 + $0x64] ss:$8 sps:$4 sm:$0xff]   ;;  %v663_v37 = vld [vmem:[#allocation7 + $0x60] ss:$8 sps:$4 sm:$0xff]   ;;  %v668_v38 = vld [vmem:[#allocation7 + $0x54] ss:$8 sps:$4 sm:$0xff]  }
  0x35   :  { %576 = vmatprep.subr.bf16.mxu0 %v645_v10  ;;  %607 = vmatprep.subr.bf16.mxu1 %v779_v0  ;;  %v666_v39 = vld [vmem:[#allocation7 + $0x50] ss:$8 sps:$4 sm:$0xff]   ;;  %v671_v40 = vld [vmem:[#allocation7 + $0x44] ss:$8 sps:$4 sm:$0xff]   ;;  %v669_v41 = vld [vmem:[#allocation7 + $0x40] ss:$8 sps:$4 sm:$0xff]  }
  0x36   :  { %v674_v42 = vld [vmem:[#allocation7 + $0x34] ss:$8 sps:$4 sm:$0xff]   ;;  %v672_v43 = vld [vmem:[#allocation7 + $0x30] ss:$8 sps:$4 sm:$0xff]   ;;  %v677_v44 = vld [vmem:[#allocation7 + $0x24] ss:$8 sps:$4 sm:$0xff]  }
  0x37   :  { %v675_v45 = vld [vmem:[#allocation7 + $0x20] ss:$8 sps:$4 sm:$0xff]   ;;  %v680_v46 = vld [vmem:[#allocation7 + $0x14] ss:$8 sps:$4 sm:$0xff]   ;;  %v678_v47 = vld [vmem:[#allocation7 + $0x10] ss:$8 sps:$4 sm:$0xff]  }
  0x38   :  { %577 = vmatpush3.bf16.msra.mxu0 %v646_v11  ;;  %608 = vmatpush3.bf16.msra.mxu1 %v647_v12  ;;  %v683_v48 = vld [vmem:[#allocation7 + $0x4] ss:$8 sps:$4 sm:$0xff]   ;;  %v681_v49 = vld [vmem:[#allocation7] ss:$8 sps:$4 sm:$0xff]   ;;  %v529_v53 = vld [vmem:[%s844_s2] ss:$0 sm:$0xff] }
  0x39   :  { %578 = vmatprep.subr.bf16.mxu0 %v648_v13  ;;  %609 = vmatprep.subr.bf16.mxu1 %v779_v0  ;;  %v376_v7 = vsub.s32 0, %v375_v6  ;;  %v372_v8 = vld [vmem:[%s846_s4] sm:$0x3]  ;;  %v380_v9 = vsub.s32 1, %v375_v6 }
  0x3b   :  { %v377_v10 = vrot.slane %v372_v8, %v376_v7  ;;  %v381_v11 = vrot.slane %v372_v8, %v380_v9 }
  0x3c   :  { %579 = vmatpush3.bf16.msra.mxu0 %v649_v14  ;;  %610 = vmatpush3.bf16.msra.mxu1 %v650_v15 }
  0x3d   :  { %580 = vmatprep.subr.bf16.mxu0 %v651_v16  ;;  %611 = vmatprep.subr.bf16.mxu1 %v779_v0 }
  0x40   :  { %581 = vmatpush3.bf16.msra.mxu0 %v652_v17  ;;  %612 = vmatpush3.bf16.msra.mxu1 %v653_v18 }
  0x41   :  { %582 = vmatprep.subr.bf16.mxu0 %v654_v19  ;;  %613 = vmatprep.subr.bf16.mxu1 %v779_v0 }
  0x44   :  { %583 = vmatpush3.bf16.msra.mxu0 %v655_v20  ;;  %614 = vmatpush3.bf16.msra.mxu1 %v656_v21 }
  0x45   :  { %584 = vmatprep.subr.bf16.mxu0 %v657_v22  ;;  %615 = vmatprep.subr.bf16.mxu1 %v779_v0 }
  0x48   :  { %585 = vmatpush3.bf16.msra.mxu0 %v658_v25  ;;  %616 = vmatpush3.bf16.msra.mxu1 %v659_v28 }
  0x49   :  { %464 = vmatprep.subr.bf16.mxu0 %v662_v32 }
  0x4b   :  { %304 = vmatmul.mubr.bf16.vlgmr.msra.gmra.mxu0 %v69_v33  ;;  %618 = vmatmul.mubr.bf16.vlgmr.msra.gmra.mxu1 %v71_v35 }
  0x4c   :  { %465 = vmatpush1.bf16.msra.mxu0 %v660_v34  ;;  %496 = vmatprep.mubr.bf16.mxu0 %v781_v50 }
  0x4d   :  { %466 = vmatprep.subr.bf16.mxu0 %v665_v36 }
  0x50   :  { %467 = vmatpush1.bf16.msra.mxu0 %v663_v37 }
  0x51   :  { %468 = vmatprep.subr.bf16.mxu0 %v668_v38 }
  0x54   :  { %469 = vmatpush1.bf16.msra.mxu0 %v666_v39 }
  0x55   :  { %470 = vmatprep.subr.bf16.mxu0 %v671_v40 }
  0x58   :  { %471 = vmatpush1.bf16.msra.mxu0 %v669_v41 }
  0x59   :  { %472 = vmatprep.subr.bf16.mxu0 %v674_v42 }
  0x5c   :  { %473 = vmatpush1.bf16.msra.mxu0 %v672_v43 }
  0x5d   :  { %474 = vmatprep.subr.bf16.mxu0 %v677_v44 }
  0x60   :  { %475 = vmatpush1.bf16.msra.mxu0 %v675_v45 }
  0x61   :  { %476 = vmatprep.subr.bf16.mxu0 %v680_v46 }
  0x64   :  { %477 = vmatpush1.bf16.msra.mxu0 %v678_v47 }
  0x65   :  { %478 = vmatprep.subr.bf16.mxu0 %v683_v48 }
  0x68   :  { %479 = vmatpush1.bf16.msra.mxu0 %v681_v49 }
 0x10b   :  { %v586_v51 = vpop.f32.mrf.mxu0  ;;  %v346_v52 = vpop.f32.mrf.mxu1 }
 0x10d   :  { %v587_v54 = vpop.f32.mrf.mxu0  ;;  %v619_v56 = vpop.f32.mrf.mxu1 }
 0x10e   :  { %v588_v55 = vadd.f32 %v587_v54, %v586_v51 }
 0x10f   :  { %v589_v57 = vpop.f32.mrf.mxu0  ;;  %v349_v59 = vpop.f32.mrf.mxu1 }
 0x110   :  { %v306_v58 = vadd.f32 %v588_v55, %v529_v53 }
 0x111   :  { %v590_v60 = vpop.f32.mrf.mxu0  ;;  %v620_v62 = vpop.f32.mrf.mxu1 }
 0x112   :  { %v591_v61 = vadd.f32 %v590_v60, %v589_v57  ;;  %v347_v63 = vadd.f32 %v346_v52, %v306_v58 }
 0x114   :  { %v309_v0 = vadd.f32 %v591_v61, %v529_v53  ;;  %v353_v2 = vmax.f32 %v347_v63, 0.0 }
 0x116   :  { %v350_v1 = vadd.f32 %v349_v59, %v309_v0 }
 0x118   :  { %v354_v3 = vmax.f32 %v350_v1, 0.0 }
 0x11a   :  { %v355_v4 = vpack.c.bf16 %v354_v3, %v353_v2 }
 0x11c   :  { %497 = vmatmul.mubr.bf16.vlgmr.msra.gmra.mxu0 %v355_v4 }
 0x1dc   :  { %v498_v12 = vpop.f32.mrf.mxu0 }
 0x1dd   :  { %v499_v13 = vadd.f32 %v498_v12, %v377_v10 }
 0x1de   :  { %v500_v14 = vpop.f32.mrf.mxu0 }
 0x1df   :  { %507 = vst [vmem:[#allocation8] sm:$0xff] %v499_v13  ;;  %v501_v15 = vadd.f32 %v500_v14, %v381_v11 }
 0x1e0   :  { %v502_v16 = vpop.f32.mrf.mxu0 }
 0x1e1   :  { %508 = vst [vmem:[#allocation8 + $0x8] sm:$0xff] %v501_v15  ;;  %v503_v17 = vadd.f32 %v502_v16, %v377_v10 }
 0x1e2   :  { %v504_v18 = vpop.f32.mrf.mxu0 }
 0x1e3   :  { %509 = vst [vmem:[#allocation8 + $0x10] sm:$0xff] %v503_v17  ;;  %v505_v19 = vadd.f32 %v504_v18, %v381_v11 }
 0x1e5   :  { %510 = vst [vmem:[#allocation8 + $0x18] sm:$0xff] %v505_v19 }
 0x1e6   :  { %755 = shalt.err (!%p752_p5)
}
 0x1e7   :  { %s783_s4 = smov 256   ;;  %s784_s17 = smov 16  }
 0x1e8   :  { %522 = dma.vmem_to_hbm [thread:$0]  %s517_s15, 512, %s847_s5, [#allocation4], %s783_s4, %s783_s4, %s784_s17  }
 0x1e9   :  { %768 = dma.done.wait [#allocation4], 512  }
 0x1ea   :  { %769 = vsyncadd [#allocation4], 4294966784 }
 0x1eb   :  { %526 = vsyncpa [#allocation3], 1 }
 0x1ec   :  { %527 = vsyncpa [#allocation6], 1 }
 0x1ed   :  { %528 = vsyncpa [#allocation4], 1 }

</bundles_post_ra>
